<compile_context>
chip_gen: v6e
topology: v6e:2x2x1
jax: 0.10.0
libtpu: 0.0.40
codegen_flags: <defaults>
</compile_context>

<pallas_src>
import math

import jax
import jax.numpy as jnp
from jax.experimental import pallas as pl
from jax.experimental.pallas import tpu as pltpu

D_MODEL = 32
N_HEAD = 4
HEAD_DIM = D_MODEL // N_HEAD
EPS = 1e-5  # nn.LayerNorm default

# ---- packed parameter slab layout (rows, width = D_MODEL) -------------------
R_WIN = 0                               # w_in  (3D, D): q/k/v, head h = rows h*8..
R_WOUT = R_WIN + 3 * D_MODEL            # w_out.T (D, D): head h = rows h*8..
R_W1 = R_WOUT + D_MODEL                 # w1.T (D, D)
R_W2 = R_W1 + D_MODEL                   # w2.T (D, D)
R_BQ = R_W2 + D_MODEL                   # per-head q bias, row h, lanes [0:HEAD_DIM]
R_BK = R_BQ + N_HEAD
R_BV = R_BK + N_HEAD
R_BOUT = R_BV + N_HEAD                  # out_proj bias (1, D)
R_B1 = R_BOUT + 1
R_B2 = R_B1 + 1
R_G1 = R_B2 + 1
R_BE1 = R_G1 + 1
R_G2 = R_BE1 + 1
R_BE2 = R_G2 + 1
SLAB_ROWS = ((R_BE2 + 1 + 7) // 8) * 8  # pad to multiple of 8 sublanes -> 216


def pack_params(p):
    """Pack the 12 PyTorch-layout parameter tensors into one (216, 32) slab."""
    D, H, HD = D_MODEL, N_HEAD, HEAD_DIM

    def row(v):  # (D,) or (1, D) -> (1, D)
        return jnp.reshape(v.astype(jnp.float32), (1, D))

    def head_rows(vec):  # (D,) -> (N_HEAD, D); row h holds head-h bias in lanes [0:HD]
        out = jnp.zeros((H, D), jnp.float32)
        return out.at[:, :HD].set(jnp.reshape(vec.astype(jnp.float32), (H, HD)))

    b_in = jnp.reshape(p["b_in"], (3 * D,))
    slab = jnp.concatenate(
        [
            p["w_in"].astype(jnp.float32),        # (96, 32) q/k/v proj, per-head rows
            p["w_out"].T.astype(jnp.float32),     # (32, 32) out_proj, transposed
            p["w1"].T.astype(jnp.float32),        # (32, 32)
            p["w2"].T.astype(jnp.float32),        # (32, 32)
            head_rows(b_in[:D]),                  # (4, 32) q bias per head
            head_rows(b_in[D:2 * D]),             # (4, 32) k bias per head
            head_rows(b_in[2 * D:]),              # (4, 32) v bias per head
            row(p["b_out"]), row(p["b1"]), row(p["b2"]),
            row(p["g1"]), row(p["be1"]), row(p["g2"]), row(p["be2"]),
        ],
        axis=0,
    )
    pad = SLAB_ROWS - slab.shape[0]
    return jnp.pad(slab, ((0, pad), (0, 0)))


def _layernorm(v, gamma, beta):
    mu = jnp.mean(v, axis=-1, keepdims=True)
    var = jnp.mean(jnp.square(v - mu), axis=-1, keepdims=True)
    return (v - mu) * jax.lax.rsqrt(var + EPS) * gamma + beta


def encoder_layer_kernel(x_ref, slab_ref, o_ref):
    BT, S, D = x_ref.shape                       # static block shape
    N = BT * S
    x = x_ref[...].reshape(N, D)                 # merge leading dims (free)

    # ---- self-attention block: x = x + MHA(norm1(x)) ----
    xn = _layernorm(x, slab_ref[R_G1:R_G1 + 1, :], slab_ref[R_BE1:R_BE1 + 1, :])

    scale = 1.0 / math.sqrt(HEAD_DIM)
    attn = jnp.zeros((N, D), jnp.float32)
    for h in range(N_HEAD):                      # static unrolled head loop
        r = h * HEAD_DIM
        wq_h = slab_ref[R_WIN + r:R_WIN + r + HEAD_DIM, :]                 # (8, 32)
        wk_h = slab_ref[R_WIN + D_MODEL + r:R_WIN + D_MODEL + r + HEAD_DIM, :]
        wv_h = slab_ref[R_WIN + 2 * D_MODEL + r:R_WIN + 2 * D_MODEL + r + HEAD_DIM, :]
        bq_h = slab_ref[R_BQ + h:R_BQ + h + 1, :HEAD_DIM]                  # (1, 8)
        bk_h = slab_ref[R_BK + h:R_BK + h + 1, :HEAD_DIM]
        bv_h = slab_ref[R_BV + h:R_BV + h + 1, :HEAD_DIM]

        # per-head projections; outputs live at lane offset 0 (no lane slicing)
        qh = (jnp.einsum('nd,kd->nk', xn, wq_h,
                         preferred_element_type=jnp.float32) + bq_h) * scale
        kh = jnp.einsum('nd,kd->nk', xn, wk_h,
                        preferred_element_type=jnp.float32) + bk_h
        vh = jnp.einsum('nd,kd->nk', xn, wv_h,
                        preferred_element_type=jnp.float32) + bv_h

        qh = qh.reshape(BT, S, HEAD_DIM)
        kh = kh.reshape(BT, S, HEAD_DIM)
        vh = vh.reshape(BT, S, HEAD_DIM)

        # attention batched over the whole batch tile in one contraction
        s = jnp.einsum('bqd,bkd->bqk', qh, kh, preferred_element_type=jnp.float32)
        s = s - jnp.max(s, axis=-1, keepdims=True)
        p = jnp.exp(s)
        p = p * (1.0 / jnp.sum(p, axis=-1, keepdims=True))   # exact recip (cheap: (BT,S,1))
        oh = jnp.einsum('bqk,bkd->bqd', p, vh, preferred_element_type=jnp.float32)

        # fold out_proj into the head loop (no concat): acc += oh @ w_out[:, h].T
        w_out_hT = slab_ref[R_WOUT + r:R_WOUT + r + HEAD_DIM, :]           # (8, 32)
        attn = attn + jnp.dot(oh.reshape(N, HEAD_DIM), w_out_hT,
                              preferred_element_type=jnp.float32)

    attn = attn + slab_ref[R_BOUT:R_BOUT + 1, :]
    x = x + attn

    # ---- feed-forward block: x = x + FFN(norm2(x)) ----
    xn2 = _layernorm(x, slab_ref[R_G2:R_G2 + 1, :], slab_ref[R_BE2:R_BE2 + 1, :])
    w1t = slab_ref[R_W1:R_W1 + D_MODEL, :]
    w2t = slab_ref[R_W2:R_W2 + D_MODEL, :]
    h1 = jnp.maximum(
        jnp.dot(xn2, w1t, preferred_element_type=jnp.float32)
        + slab_ref[R_B1:R_B1 + 1, :], 0.0)
    ff = jnp.dot(h1, w2t, preferred_element_type=jnp.float32) + slab_ref[R_B2:R_B2 + 1, :]

    o_ref[...] = (x + ff).reshape(BT, S, D).astype(o_ref.dtype)


def _choose_b_tile(batch, cap=64):
    """Largest divisor of `batch` <= cap that keeps >= 2 programs (v7x has 2 TCs)."""
    if batch < 2:
        return max(batch, 1)
    limit = min(cap, batch // 2)
    best = 1
    for t in range(1, limit + 1):
        if batch % t == 0:
            best = t
    return best


def sets_transformer_encoder_layer(x, x_coords, params, b_tile=None):
    del x_coords  # unused by the PyTorch forward()
    B, S, D = x.shape
    assert D == D_MODEL
    if b_tile is None:
        b_tile = _choose_b_tile(B)
    assert B % b_tile == 0

    slab = pack_params(params)
    grid = (B // b_tile,)

    return pl.pallas_call(
        encoder_layer_kernel,
        out_shape=jax.ShapeDtypeStruct((B, S, D), x.dtype),
        grid=grid,
        in_specs=[
            pl.BlockSpec((b_tile, S, D), lambda b: (b, 0, 0)),
            pl.BlockSpec(slab.shape, lambda b: (0, 0)),   # constant block -> DMA'd once
        ],
        out_specs=pl.BlockSpec((b_tile, S, D), lambda b: (b, 0, 0)),
        compiler_params=pltpu.CompilerParams(dimension_semantics=("parallel",)),
    )(x, slab)


def reference(x, p):
    """Pure-JAX reference of the PyTorch forward (inference, dropout off)."""
    def ln(v, g, b):
        mu = v.mean(-1, keepdims=True)
        var = ((v - mu) ** 2).mean(-1, keepdims=True)
        return (v - mu) / jnp.sqrt(var + EPS) * g + b

    B, S, D = x.shape
    xn = ln(x, p["g1"][0], p["be1"][0])
    qkv = jnp.einsum("bsd,ed->bse", xn, p["w_in"]) + p["b_in"][0]
    q, k, v = jnp.split(qkv, 3, axis=-1)
    qh = q.reshape(B, S, N_HEAD, HEAD_DIM).transpose(0, 2, 1, 3)
    kh = k.reshape(B, S, N_HEAD, HEAD_DIM).transpose(0, 2, 1, 3)
    vh = v.reshape(B, S, N_HEAD, HEAD_DIM).transpose(0, 2, 1, 3)
    s = jnp.einsum("bhqd,bhkd->bhqk", qh, kh) / math.sqrt(HEAD_DIM)
    pw = jax.nn.softmax(s, axis=-1)
    ao = jnp.einsum("bhqk,bhkd->bhqd", pw, vh).transpose(0, 2, 1, 3).reshape(B, S, D)
    ao = ao @ p["w_out"].T + p["b_out"][0]
    x = x + ao
    xn2 = ln(x, p["g2"][0], p["be2"][0])
    ff = jax.nn.relu(xn2 @ p["w1"].T + p["b1"][0]) @ p["w2"].T + p["b2"][0]
    return x + ff


def make_params(key):
    ks = jax.random.split(key, 12)

    def nrm(k, shape, scale=0.05):
        return (scale * jax.random.normal(k, shape)).astype(jnp.float32)

    return {
        "w_in": nrm(ks[0], (3 * D_MODEL, D_MODEL)),
        "b_in": nrm(ks[1], (1, 3 * D_MODEL)),
        "w_out": nrm(ks[2], (D_MODEL, D_MODEL)),
        "b_out": nrm(ks[3], (1, D_MODEL)),
        "w1": nrm(ks[4], (D_MODEL, D_MODEL)),
        "b1": nrm(ks[5], (1, D_MODEL)),
        "w2": nrm(ks[6], (D_MODEL, D_MODEL)),
        "b2": nrm(ks[7], (1, D_MODEL)),
        "g1": (1.0 + 0.1 * jax.random.normal(ks[8], (1, D_MODEL))).astype(jnp.float32),
        "be1": nrm(ks[9], (1, D_MODEL), 0.1),
        "g2": (1.0 + 0.1 * jax.random.normal(ks[10], (1, D_MODEL))).astype(jnp.float32),
        "be2": nrm(ks[11], (1, D_MODEL), 0.1),
    }


if __name__ == "__main__":
    key = jax.random.PRNGKey(0)
    k_x, k_c, k_p, k_x2 = jax.random.split(key, 4)
    params = make_params(k_p)

    # primary small-shape check (B=2 -> b_tile=1, grid=(2,))
    B, S, D = 2, 8, D_MODEL
    x = jax.random.normal(k_x, (B, S, D), jnp.float32)
    x_coords = jax.random.normal(k_c, (B, S, 2), jnp.float32)  # unused by forward()
    out = jax.block_until_ready(sets_transformer_encoder_layer(x, x_coords, params))
    ref = reference(x, params)
    assert out.shape == (B, S, D)
    assert jnp.allclose(out, ref, atol=1e-4, rtol=1e-4), \
        f"max abs err {jnp.max(jnp.abs(out - ref))}"

    # coarsened-tile path check (B=8 -> b_tile=4, grid=(2,))
    B2 = 8
    x2 = jax.random.normal(k_x2, (B2, S, D), jnp.float32)
    out2 = jax.block_until_ready(sets_transformer_encoder_layer(x2, None, params))
    ref2 = reference(x2, params)
    assert jnp.allclose(out2, ref2, atol=1e-4, rtol=1e-4), \
        f"max abs err {jnp.max(jnp.abs(out2 - ref2))}"

    print("KERNEL_OK")
</pallas_src>

<mosaic_0001>
module attributes {stable_mosaic.version = 11 : i64} {
  func.func @encoder_layer_kernel(%arg0: i32, %arg1: memref<1x8x32xf32, #tpu.memory_space<vmem>>, %arg2: memref<216x32xf32, #tpu.memory_space<vmem>>, %arg3: memref<1x8x32xf32, #tpu.memory_space<vmem>>) attributes {dimension_semantics = [#tpu.dimension_semantics<parallel>], iteration_bounds = array<i64: 2>, scalar_prefetch = 0 : i64, scratch_operands = 0 : i64, tpu.core_type = #tpu.core_type<tc>, window_params = [{transform_indices = @transform_0, window_bounds = array<i64: 1, 8, 32>}, {pipeline_mode = #tpu.pipeline_mode<synchronous>, transform_indices = @transform_1, window_bounds = array<i64: 216, 32>}, {transform_indices = @transform_2, window_bounds = array<i64: 1, 8, 32>}]} {
    %c0 = arith.constant 0 : index
    %c0_0 = arith.constant 0 : index
    %c0_1 = arith.constant 0 : index
    %0 = vector.load %arg1[%c0, %c0_0, %c0_1] : memref<1x8x32xf32, #tpu.memory_space<vmem>>, vector<1x8x32xf32>
    %1 = vector.shape_cast %0 : vector<1x8x32xf32> to vector<8x32xf32>
    %c207 = arith.constant 207 : index
    %c0_2 = arith.constant 0 : index
    %2 = vector.load %arg2[%c207, %c0_2] : memref<216x32xf32, #tpu.memory_space<vmem>>, vector<1x32xf32>
    %c208 = arith.constant 208 : index
    %c0_3 = arith.constant 0 : index
    %3 = vector.load %arg2[%c208, %c0_3] : memref<216x32xf32, #tpu.memory_space<vmem>>, vector<1x32xf32>
    %cst = arith.constant dense<0.000000e+00> : vector<8xf32>
    %4 = vector.multi_reduction <add>, %1, %cst [1] : vector<8x32xf32> to vector<8xf32>
    %5 = vector.shape_cast %4 : vector<8xf32> to vector<8x1xf32>
    %cst_4 = arith.constant 3.200000e+01 : f32
    %6 = vector.broadcast %cst_4 : f32 to vector<8x1xf32>
    %7 = arith.divf %5, %6 : vector<8x1xf32>
    %8 = vector.broadcast %7 : vector<8x1xf32> to vector<8x32xf32>
    %9 = arith.subf %1, %8 : vector<8x32xf32>
    %10 = arith.mulf %9, %9 : vector<8x32xf32>
    %cst_5 = arith.constant dense<0.000000e+00> : vector<8xf32>
    %11 = vector.multi_reduction <add>, %10, %cst_5 [1] : vector<8x32xf32> to vector<8xf32>
    %12 = vector.shape_cast %11 : vector<8xf32> to vector<8x1xf32>
    %cst_6 = arith.constant 3.200000e+01 : f32
    %13 = vector.broadcast %cst_6 : f32 to vector<8x1xf32>
    %14 = arith.divf %12, %13 : vector<8x1xf32>
    %15 = vector.broadcast %7 : vector<8x1xf32> to vector<8x32xf32>
    %16 = arith.subf %1, %15 : vector<8x32xf32>
    %cst_7 = arith.constant 9.99999974E-6 : f32
    %17 = vector.broadcast %cst_7 : f32 to vector<8x1xf32>
    %18 = arith.addf %14, %17 : vector<8x1xf32>
    %19 = math.rsqrt %18 : vector<8x1xf32>
    %20 = vector.broadcast %19 : vector<8x1xf32> to vector<8x32xf32>
    %21 = arith.mulf %16, %20 : vector<8x32xf32>
    %22 = vector.broadcast %2 : vector<1x32xf32> to vector<8x32xf32>
    %23 = arith.mulf %21, %22 : vector<8x32xf32>
    %24 = vector.broadcast %3 : vector<1x32xf32> to vector<8x32xf32>
    %25 = arith.addf %23, %24 : vector<8x32xf32>
    %cst_8 = arith.constant 0.000000e+00 : f32
    %26 = vector.broadcast %cst_8 : f32 to vector<8x32xf32>
    %c0_9 = arith.constant 0 : index
    %c0_10 = arith.constant 0 : index
    %27 = vector.load %arg2[%c0_9, %c0_10] : memref<216x32xf32, #tpu.memory_space<vmem>>, vector<8x32xf32>
    %c32 = arith.constant 32 : index
    %c0_11 = arith.constant 0 : index
    %28 = vector.load %arg2[%c32, %c0_11] : memref<216x32xf32, #tpu.memory_space<vmem>>, vector<8x32xf32>
    %c64 = arith.constant 64 : index
    %c0_12 = arith.constant 0 : index
    %29 = vector.load %arg2[%c64, %c0_12] : memref<216x32xf32, #tpu.memory_space<vmem>>, vector<8x32xf32>
    %c192 = arith.constant 192 : index
    %c0_13 = arith.constant 0 : index
    %30 = vector.load %arg2[%c192, %c0_13] : memref<216x32xf32, #tpu.memory_space<vmem>>, vector<1x8xf32>
    %c196 = arith.constant 196 : index
    %c0_14 = arith.constant 0 : index
    %31 = vector.load %arg2[%c196, %c0_14] : memref<216x32xf32, #tpu.memory_space<vmem>>, vector<1x8xf32>
    %c200 = arith.constant 200 : index
    %c0_15 = arith.constant 0 : index
    %32 = vector.load %arg2[%c200, %c0_15] : memref<216x32xf32, #tpu.memory_space<vmem>>, vector<1x8xf32>
    "tpu.trace_start"() <{level = 10 : i32, message = "nd,kd->nk"}> : () -> ()
    %cst_16 = arith.constant dense<0.000000e+00> : vector<8x8xf32>
    %33 = tpu.matmul %25, %27, %cst_16 {dimension_numbers = #tpu.dot_dimension_numbers<[1], [1], [0], [0], [0, 0, 1, 0], [], []>} : vector<8x32xf32>, vector<8x32xf32>, vector<8x8xf32> -> vector<8x8xf32>
    "tpu.trace_stop"() : () -> ()
    %34 = vector.broadcast %30 : vector<1x8xf32> to vector<8x8xf32>
    %35 = arith.addf %33, %34 : vector<8x8xf32>
    %cst_17 = arith.constant 0.353553385 : f32
    %36 = vector.broadcast %cst_17 : f32 to vector<8x8xf32>
    %37 = arith.mulf %35, %36 : vector<8x8xf32>
    "tpu.trace_start"() <{level = 10 : i32, message = "nd,kd->nk"}> : () -> ()
    %cst_18 = arith.constant dense<0.000000e+00> : vector<8x8xf32>
    %38 = tpu.matmul %25, %28, %cst_18 {dimension_numbers = #tpu.dot_dimension_numbers<[1], [1], [0], [0], [0, 0, 1, 0], [], []>} : vector<8x32xf32>, vector<8x32xf32>, vector<8x8xf32> -> vector<8x8xf32>
    "tpu.trace_stop"() : () -> ()
    %39 = vector.broadcast %31 : vector<1x8xf32> to vector<8x8xf32>
    %40 = arith.addf %38, %39 : vector<8x8xf32>
    "tpu.trace_start"() <{level = 10 : i32, message = "nd,kd->nk"}> : () -> ()
    %cst_19 = arith.constant dense<0.000000e+00> : vector<8x8xf32>
    %41 = tpu.matmul %25, %29, %cst_19 {dimension_numbers = #tpu.dot_dimension_numbers<[1], [1], [0], [0], [0, 0, 1, 0], [], []>} : vector<8x32xf32>, vector<8x32xf32>, vector<8x8xf32> -> vector<8x8xf32>
    "tpu.trace_stop"() : () -> ()
    %42 = vector.broadcast %32 : vector<1x8xf32> to vector<8x8xf32>
    %43 = arith.addf %41, %42 : vector<8x8xf32>
    %44 = vector.shape_cast %37 : vector<8x8xf32> to vector<1x8x8xf32>
    %45 = vector.shape_cast %40 : vector<8x8xf32> to vector<1x8x8xf32>
    %46 = vector.shape_cast %43 : vector<8x8xf32> to vector<1x8x8xf32>
    "tpu.trace_start"() <{level = 10 : i32, message = "bqd,bkd->bqk"}> : () -> ()
    %cst_20 = arith.constant dense<0.000000e+00> : vector<1x8x8xf32>
    %47 = tpu.matmul %44, %45, %cst_20 {dimension_numbers = #tpu.dot_dimension_numbers<[2], [2], [1], [1], [0, 0, 0, 1, 1, 1], [0], [0]>} : vector<1x8x8xf32>, vector<1x8x8xf32>, vector<1x8x8xf32> -> vector<1x8x8xf32>
    "tpu.trace_stop"() : () -> ()
    %cst_21 = arith.constant dense<0xFF800000> : vector<1x8xf32>
    %48 = vector.multi_reduction <maximumf>, %47, %cst_21 [2] : vector<1x8x8xf32> to vector<1x8xf32>
    %49 = vector.shape_cast %48 : vector<1x8xf32> to vector<1x8x1xf32>
    %50 = vector.broadcast %49 : vector<1x8x1xf32> to vector<1x8x8xf32>
    %51 = arith.subf %47, %50 : vector<1x8x8xf32>
    %52 = math.exp %51 : vector<1x8x8xf32>
    %cst_22 = arith.constant dense<0.000000e+00> : vector<1x8xf32>
    %53 = vector.multi_reduction <add>, %52, %cst_22 [2] : vector<1x8x8xf32> to vector<1x8xf32>
    %54 = vector.shape_cast %53 : vector<1x8xf32> to vector<1x8x1xf32>
    %cst_23 = arith.constant 1.000000e+00 : f32
    %55 = vector.broadcast %cst_23 : f32 to vector<1x8x1xf32>
    %56 = arith.divf %55, %54 : vector<1x8x1xf32>
    %57 = vector.broadcast %56 : vector<1x8x1xf32> to vector<1x8x8xf32>
    %58 = arith.mulf %52, %57 : vector<1x8x8xf32>
    "tpu.trace_start"() <{level = 10 : i32, message = "bqk,bkd->bqd"}> : () -> ()
    %cst_24 = arith.constant dense<0.000000e+00> : vector<1x8x8xf32>
    %59 = tpu.matmul %58, %46, %cst_24 {dimension_numbers = #tpu.dot_dimension_numbers<[2], [1], [1], [2], [0, 0, 0, 1, 1, 2], [0], [0]>} : vector<1x8x8xf32>, vector<1x8x8xf32>, vector<1x8x8xf32> -> vector<1x8x8xf32>
    "tpu.trace_stop"() : () -> ()
    %c96 = arith.constant 96 : index
    %c0_25 = arith.constant 0 : index
    %60 = vector.load %arg2[%c96, %c0_25] : memref<216x32xf32, #tpu.memory_space<vmem>>, vector<8x32xf32>
    %61 = vector.shape_cast %59 : vector<1x8x8xf32> to vector<8x8xf32>
    %cst_26 = arith.constant dense<0.000000e+00> : vector<8x32xf32>
    %62 = tpu.matmul %61, %60, %cst_26 {dimension_numbers = #tpu.dot_dimension_numbers<[1], [0], [0], [1], [0, 0, 1, 1], [], []>} : vector<8x8xf32>, vector<8x32xf32>, vector<8x32xf32> -> vector<8x32xf32>
    %63 = arith.addf %26, %62 : vector<8x32xf32>
    %c8 = arith.constant 8 : index
    %c0_27 = arith.constant 0 : index
    %64 = vector.load %arg2[%c8, %c0_27] : memref<216x32xf32, #tpu.memory_space<vmem>>, vector<8x32xf32>
    %c40 = arith.constant 40 : index
    %c0_28 = arith.constant 0 : index
    %65 = vector.load %arg2[%c40, %c0_28] : memref<216x32xf32, #tpu.memory_space<vmem>>, vector<8x32xf32>
    %c72 = arith.constant 72 : index
    %c0_29 = arith.constant 0 : index
    %66 = vector.load %arg2[%c72, %c0_29] : memref<216x32xf32, #tpu.memory_space<vmem>>, vector<8x32xf32>
    %c193 = arith.constant 193 : index
    %c0_30 = arith.constant 0 : index
    %67 = vector.load %arg2[%c193, %c0_30] : memref<216x32xf32, #tpu.memory_space<vmem>>, vector<1x8xf32>
    %c197 = arith.constant 197 : index
    %c0_31 = arith.constant 0 : index
    %68 = vector.load %arg2[%c197, %c0_31] : memref<216x32xf32, #tpu.memory_space<vmem>>, vector<1x8xf32>
    %c201 = arith.constant 201 : index
    %c0_32 = arith.constant 0 : index
    %69 = vector.load %arg2[%c201, %c0_32] : memref<216x32xf32, #tpu.memory_space<vmem>>, vector<1x8xf32>
    "tpu.trace_start"() <{level = 10 : i32, message = "nd,kd->nk"}> : () -> ()
    %cst_33 = arith.constant dense<0.000000e+00> : vector<8x8xf32>
    %70 = tpu.matmul %25, %64, %cst_33 {dimension_numbers = #tpu.dot_dimension_numbers<[1], [1], [0], [0], [0, 0, 1, 0], [], []>} : vector<8x32xf32>, vector<8x32xf32>, vector<8x8xf32> -> vector<8x8xf32>
    "tpu.trace_stop"() : () -> ()
    %71 = vector.broadcast %67 : vector<1x8xf32> to vector<8x8xf32>
    %72 = arith.addf %70, %71 : vector<8x8xf32>
    %cst_34 = arith.constant 0.353553385 : f32
    %73 = vector.broadcast %cst_34 : f32 to vector<8x8xf32>
    %74 = arith.mulf %72, %73 : vector<8x8xf32>
    "tpu.trace_start"() <{level = 10 : i32, message = "nd,kd->nk"}> : () -> ()
    %cst_35 = arith.constant dense<0.000000e+00> : vector<8x8xf32>
    %75 = tpu.matmul %25, %65, %cst_35 {dimension_numbers = #tpu.dot_dimension_numbers<[1], [1], [0], [0], [0, 0, 1, 0], [], []>} : vector<8x32xf32>, vector<8x32xf32>, vector<8x8xf32> -> vector<8x8xf32>
    "tpu.trace_stop"() : () -> ()
    %76 = vector.broadcast %68 : vector<1x8xf32> to vector<8x8xf32>
    %77 = arith.addf %75, %76 : vector<8x8xf32>
    "tpu.trace_start"() <{level = 10 : i32, message = "nd,kd->nk"}> : () -> ()
    %cst_36 = arith.constant dense<0.000000e+00> : vector<8x8xf32>
    %78 = tpu.matmul %25, %66, %cst_36 {dimension_numbers = #tpu.dot_dimension_numbers<[1], [1], [0], [0], [0, 0, 1, 0], [], []>} : vector<8x32xf32>, vector<8x32xf32>, vector<8x8xf32> -> vector<8x8xf32>
    "tpu.trace_stop"() : () -> ()
    %79 = vector.broadcast %69 : vector<1x8xf32> to vector<8x8xf32>
    %80 = arith.addf %78, %79 : vector<8x8xf32>
    %81 = vector.shape_cast %74 : vector<8x8xf32> to vector<1x8x8xf32>
    %82 = vector.shape_cast %77 : vector<8x8xf32> to vector<1x8x8xf32>
    %83 = vector.shape_cast %80 : vector<8x8xf32> to vector<1x8x8xf32>
    "tpu.trace_start"() <{level = 10 : i32, message = "bqd,bkd->bqk"}> : () -> ()
    %cst_37 = arith.constant dense<0.000000e+00> : vector<1x8x8xf32>
    %84 = tpu.matmul %81, %82, %cst_37 {dimension_numbers = #tpu.dot_dimension_numbers<[2], [2], [1], [1], [0, 0, 0, 1, 1, 1], [0], [0]>} : vector<1x8x8xf32>, vector<1x8x8xf32>, vector<1x8x8xf32> -> vector<1x8x8xf32>
    "tpu.trace_stop"() : () -> ()
    %cst_38 = arith.constant dense<0xFF800000> : vector<1x8xf32>
    %85 = vector.multi_reduction <maximumf>, %84, %cst_38 [2] : vector<1x8x8xf32> to vector<1x8xf32>
    %86 = vector.shape_cast %85 : vector<1x8xf32> to vector<1x8x1xf32>
    %87 = vector.broadcast %86 : vector<1x8x1xf32> to vector<1x8x8xf32>
    %88 = arith.subf %84, %87 : vector<1x8x8xf32>
    %89 = math.exp %88 : vector<1x8x8xf32>
    %cst_39 = arith.constant dense<0.000000e+00> : vector<1x8xf32>
    %90 = vector.multi_reduction <add>, %89, %cst_39 [2] : vector<1x8x8xf32> to vector<1x8xf32>
    %91 = vector.shape_cast %90 : vector<1x8xf32> to vector<1x8x1xf32>
    %cst_40 = arith.constant 1.000000e+00 : f32
    %92 = vector.broadcast %cst_40 : f32 to vector<1x8x1xf32>
    %93 = arith.divf %92, %91 : vector<1x8x1xf32>
    %94 = vector.broadcast %93 : vector<1x8x1xf32> to vector<1x8x8xf32>
    %95 = arith.mulf %89, %94 : vector<1x8x8xf32>
    "tpu.trace_start"() <{level = 10 : i32, message = "bqk,bkd->bqd"}> : () -> ()
    %cst_41 = arith.constant dense<0.000000e+00> : vector<1x8x8xf32>
    %96 = tpu.matmul %95, %83, %cst_41 {dimension_numbers = #tpu.dot_dimension_numbers<[2], [1], [1], [2], [0, 0, 0, 1, 1, 2], [0], [0]>} : vector<1x8x8xf32>, vector<1x8x8xf32>, vector<1x8x8xf32> -> vector<1x8x8xf32>
    "tpu.trace_stop"() : () -> ()
    %c104 = arith.constant 104 : index
    %c0_42 = arith.constant 0 : index
    %97 = vector.load %arg2[%c104, %c0_42] : memref<216x32xf32, #tpu.memory_space<vmem>>, vector<8x32xf32>
    %98 = vector.shape_cast %96 : vector<1x8x8xf32> to vector<8x8xf32>
    %cst_43 = arith.constant dense<0.000000e+00> : vector<8x32xf32>
    %99 = tpu.matmul %98, %97, %cst_43 {dimension_numbers = #tpu.dot_dimension_numbers<[1], [0], [0], [1], [0, 0, 1, 1], [], []>} : vector<8x8xf32>, vector<8x32xf32>, vector<8x32xf32> -> vector<8x32xf32>
    %100 = arith.addf %63, %99 : vector<8x32xf32>
    %c16 = arith.constant 16 : index
    %c0_44 = arith.constant 0 : index
    %101 = vector.load %arg2[%c16, %c0_44] : memref<216x32xf32, #tpu.memory_space<vmem>>, vector<8x32xf32>
    %c48 = arith.constant 48 : index
    %c0_45 = arith.constant 0 : index
    %102 = vector.load %arg2[%c48, %c0_45] : memref<216x32xf32, #tpu.memory_space<vmem>>, vector<8x32xf32>
    %c80 = arith.constant 80 : index
    %c0_46 = arith.constant 0 : index
    %103 = vector.load %arg2[%c80, %c0_46] : memref<216x32xf32, #tpu.memory_space<vmem>>, vector<8x32xf32>
    %c194 = arith.constant 194 : index
    %c0_47 = arith.constant 0 : index
    %104 = vector.load %arg2[%c194, %c0_47] : memref<216x32xf32, #tpu.memory_space<vmem>>, vector<1x8xf32>
    %c198 = arith.constant 198 : index
    %c0_48 = arith.constant 0 : index
    %105 = vector.load %arg2[%c198, %c0_48] : memref<216x32xf32, #tpu.memory_space<vmem>>, vector<1x8xf32>
    %c202 = arith.constant 202 : index
    %c0_49 = arith.constant 0 : index
    %106 = vector.load %arg2[%c202, %c0_49] : memref<216x32xf32, #tpu.memory_space<vmem>>, vector<1x8xf32>
    "tpu.trace_start"() <{level = 10 : i32, message = "nd,kd->nk"}> : () -> ()
    %cst_50 = arith.constant dense<0.000000e+00> : vector<8x8xf32>
    %107 = tpu.matmul %25, %101, %cst_50 {dimension_numbers = #tpu.dot_dimension_numbers<[1], [1], [0], [0], [0, 0, 1, 0], [], []>} : vector<8x32xf32>, vector<8x32xf32>, vector<8x8xf32> -> vector<8x8xf32>
    "tpu.trace_stop"() : () -> ()
    %108 = vector.broadcast %104 : vector<1x8xf32> to vector<8x8xf32>
    %109 = arith.addf %107, %108 : vector<8x8xf32>
    %cst_51 = arith.constant 0.353553385 : f32
    %110 = vector.broadcast %cst_51 : f32 to vector<8x8xf32>
    %111 = arith.mulf %109, %110 : vector<8x8xf32>
    "tpu.trace_start"() <{level = 10 : i32, message = "nd,kd->nk"}> : () -> ()
    %cst_52 = arith.constant dense<0.000000e+00> : vector<8x8xf32>
    %112 = tpu.matmul %25, %102, %cst_52 {dimension_numbers = #tpu.dot_dimension_numbers<[1], [1], [0], [0], [0, 0, 1, 0], [], []>} : vector<8x32xf32>, vector<8x32xf32>, vector<8x8xf32> -> vector<8x8xf32>
    "tpu.trace_stop"() : () -> ()
    %113 = vector.broadcast %105 : vector<1x8xf32> to vector<8x8xf32>
    %114 = arith.addf %112, %113 : vector<8x8xf32>
    "tpu.trace_start"() <{level = 10 : i32, message = "nd,kd->nk"}> : () -> ()
    %cst_53 = arith.constant dense<0.000000e+00> : vector<8x8xf32>
    %115 = tpu.matmul %25, %103, %cst_53 {dimension_numbers = #tpu.dot_dimension_numbers<[1], [1], [0], [0], [0, 0, 1, 0], [], []>} : vector<8x32xf32>, vector<8x32xf32>, vector<8x8xf32> -> vector<8x8xf32>
    "tpu.trace_stop"() : () -> ()
    %116 = vector.broadcast %106 : vector<1x8xf32> to vector<8x8xf32>
    %117 = arith.addf %115, %116 : vector<8x8xf32>
    %118 = vector.shape_cast %111 : vector<8x8xf32> to vector<1x8x8xf32>
    %119 = vector.shape_cast %114 : vector<8x8xf32> to vector<1x8x8xf32>
    %120 = vector.shape_cast %117 : vector<8x8xf32> to vector<1x8x8xf32>
    "tpu.trace_start"() <{level = 10 : i32, message = "bqd,bkd->bqk"}> : () -> ()
    %cst_54 = arith.constant dense<0.000000e+00> : vector<1x8x8xf32>
    %121 = tpu.matmul %118, %119, %cst_54 {dimension_numbers = #tpu.dot_dimension_numbers<[2], [2], [1], [1], [0, 0, 0, 1, 1, 1], [0], [0]>} : vector<1x8x8xf32>, vector<1x8x8xf32>, vector<1x8x8xf32> -> vector<1x8x8xf32>
    "tpu.trace_stop"() : () -> ()
    %cst_55 = arith.constant dense<0xFF800000> : vector<1x8xf32>
    %122 = vector.multi_reduction <maximumf>, %121, %cst_55 [2] : vector<1x8x8xf32> to vector<1x8xf32>
    %123 = vector.shape_cast %122 : vector<1x8xf32> to vector<1x8x1xf32>
    %124 = vector.broadcast %123 : vector<1x8x1xf32> to vector<1x8x8xf32>
    %125 = arith.subf %121, %124 : vector<1x8x8xf32>
    %126 = math.exp %125 : vector<1x8x8xf32>
    %cst_56 = arith.constant dense<0.000000e+00> : vector<1x8xf32>
    %127 = vector.multi_reduction <add>, %126, %cst_56 [2] : vector<1x8x8xf32> to vector<1x8xf32>
    %128 = vector.shape_cast %127 : vector<1x8xf32> to vector<1x8x1xf32>
    %cst_57 = arith.constant 1.000000e+00 : f32
    %129 = vector.broadcast %cst_57 : f32 to vector<1x8x1xf32>
    %130 = arith.divf %129, %128 : vector<1x8x1xf32>
    %131 = vector.broadcast %130 : vector<1x8x1xf32> to vector<1x8x8xf32>
    %132 = arith.mulf %126, %131 : vector<1x8x8xf32>
    "tpu.trace_start"() <{level = 10 : i32, message = "bqk,bkd->bqd"}> : () -> ()
    %cst_58 = arith.constant dense<0.000000e+00> : vector<1x8x8xf32>
    %133 = tpu.matmul %132, %120, %cst_58 {dimension_numbers = #tpu.dot_dimension_numbers<[2], [1], [1], [2], [0, 0, 0, 1, 1, 2], [0], [0]>} : vector<1x8x8xf32>, vector<1x8x8xf32>, vector<1x8x8xf32> -> vector<1x8x8xf32>
    "tpu.trace_stop"() : () -> ()
    %c112 = arith.constant 112 : index
    %c0_59 = arith.constant 0 : index
    %134 = vector.load %arg2[%c112, %c0_59] : memref<216x32xf32, #tpu.memory_space<vmem>>, vector<8x32xf32>
    %135 = vector.shape_cast %133 : vector<1x8x8xf32> to vector<8x8xf32>
    %cst_60 = arith.constant dense<0.000000e+00> : vector<8x32xf32>
    %136 = tpu.matmul %135, %134, %cst_60 {dimension_numbers = #tpu.dot_dimension_numbers<[1], [0], [0], [1], [0, 0, 1, 1], [], []>} : vector<8x8xf32>, vector<8x32xf32>, vector<8x32xf32> -> vector<8x32xf32>
    %137 = arith.addf %100, %136 : vector<8x32xf32>
    %c24 = arith.constant 24 : index
    %c0_61 = arith.constant 0 : index
    %138 = vector.load %arg2[%c24, %c0_61] : memref<216x32xf32, #tpu.memory_space<vmem>>, vector<8x32xf32>
    %c56 = arith.constant 56 : index
    %c0_62 = arith.constant 0 : index
    %139 = vector.load %arg2[%c56, %c0_62] : memref<216x32xf32, #tpu.memory_space<vmem>>, vector<8x32xf32>
    %c88 = arith.constant 88 : index
    %c0_63 = arith.constant 0 : index
    %140 = vector.load %arg2[%c88, %c0_63] : memref<216x32xf32, #tpu.memory_space<vmem>>, vector<8x32xf32>
    %c195 = arith.constant 195 : index
    %c0_64 = arith.constant 0 : index
    %141 = vector.load %arg2[%c195, %c0_64] : memref<216x32xf32, #tpu.memory_space<vmem>>, vector<1x8xf32>
    %c199 = arith.constant 199 : index
    %c0_65 = arith.constant 0 : index
    %142 = vector.load %arg2[%c199, %c0_65] : memref<216x32xf32, #tpu.memory_space<vmem>>, vector<1x8xf32>
    %c203 = arith.constant 203 : index
    %c0_66 = arith.constant 0 : index
    %143 = vector.load %arg2[%c203, %c0_66] : memref<216x32xf32, #tpu.memory_space<vmem>>, vector<1x8xf32>
    "tpu.trace_start"() <{level = 10 : i32, message = "nd,kd->nk"}> : () -> ()
    %cst_67 = arith.constant dense<0.000000e+00> : vector<8x8xf32>
    %144 = tpu.matmul %25, %138, %cst_67 {dimension_numbers = #tpu.dot_dimension_numbers<[1], [1], [0], [0], [0, 0, 1, 0], [], []>} : vector<8x32xf32>, vector<8x32xf32>, vector<8x8xf32> -> vector<8x8xf32>
    "tpu.trace_stop"() : () -> ()
    %145 = vector.broadcast %141 : vector<1x8xf32> to vector<8x8xf32>
    %146 = arith.addf %144, %145 : vector<8x8xf32>
    %cst_68 = arith.constant 0.353553385 : f32
    %147 = vector.broadcast %cst_68 : f32 to vector<8x8xf32>
    %148 = arith.mulf %146, %147 : vector<8x8xf32>
    "tpu.trace_start"() <{level = 10 : i32, message = "nd,kd->nk"}> : () -> ()
    %cst_69 = arith.constant dense<0.000000e+00> : vector<8x8xf32>
    %149 = tpu.matmul %25, %139, %cst_69 {dimension_numbers = #tpu.dot_dimension_numbers<[1], [1], [0], [0], [0, 0, 1, 0], [], []>} : vector<8x32xf32>, vector<8x32xf32>, vector<8x8xf32> -> vector<8x8xf32>
    "tpu.trace_stop"() : () -> ()
    %150 = vector.broadcast %142 : vector<1x8xf32> to vector<8x8xf32>
    %151 = arith.addf %149, %150 : vector<8x8xf32>
    "tpu.trace_start"() <{level = 10 : i32, message = "nd,kd->nk"}> : () -> ()
    %cst_70 = arith.constant dense<0.000000e+00> : vector<8x8xf32>
    %152 = tpu.matmul %25, %140, %cst_70 {dimension_numbers = #tpu.dot_dimension_numbers<[1], [1], [0], [0], [0, 0, 1, 0], [], []>} : vector<8x32xf32>, vector<8x32xf32>, vector<8x8xf32> -> vector<8x8xf32>
    "tpu.trace_stop"() : () -> ()
    %153 = vector.broadcast %143 : vector<1x8xf32> to vector<8x8xf32>
    %154 = arith.addf %152, %153 : vector<8x8xf32>
    %155 = vector.shape_cast %148 : vector<8x8xf32> to vector<1x8x8xf32>
    %156 = vector.shape_cast %151 : vector<8x8xf32> to vector<1x8x8xf32>
    %157 = vector.shape_cast %154 : vector<8x8xf32> to vector<1x8x8xf32>
    "tpu.trace_start"() <{level = 10 : i32, message = "bqd,bkd->bqk"}> : () -> ()
    %cst_71 = arith.constant dense<0.000000e+00> : vector<1x8x8xf32>
    %158 = tpu.matmul %155, %156, %cst_71 {dimension_numbers = #tpu.dot_dimension_numbers<[2], [2], [1], [1], [0, 0, 0, 1, 1, 1], [0], [0]>} : vector<1x8x8xf32>, vector<1x8x8xf32>, vector<1x8x8xf32> -> vector<1x8x8xf32>
    "tpu.trace_stop"() : () -> ()
    %cst_72 = arith.constant dense<0xFF800000> : vector<1x8xf32>
    %159 = vector.multi_reduction <maximumf>, %158, %cst_72 [2] : vector<1x8x8xf32> to vector<1x8xf32>
    %160 = vector.shape_cast %159 : vector<1x8xf32> to vector<1x8x1xf32>
    %161 = vector.broadcast %160 : vector<1x8x1xf32> to vector<1x8x8xf32>
    %162 = arith.subf %158, %161 : vector<1x8x8xf32>
    %163 = math.exp %162 : vector<1x8x8xf32>
    %cst_73 = arith.constant dense<0.000000e+00> : vector<1x8xf32>
    %164 = vector.multi_reduction <add>, %163, %cst_73 [2] : vector<1x8x8xf32> to vector<1x8xf32>
    %165 = vector.shape_cast %164 : vector<1x8xf32> to vector<1x8x1xf32>
    %cst_74 = arith.constant 1.000000e+00 : f32
    %166 = vector.broadcast %cst_74 : f32 to vector<1x8x1xf32>
    %167 = arith.divf %166, %165 : vector<1x8x1xf32>
    %168 = vector.broadcast %167 : vector<1x8x1xf32> to vector<1x8x8xf32>
    %169 = arith.mulf %163, %168 : vector<1x8x8xf32>
    "tpu.trace_start"() <{level = 10 : i32, message = "bqk,bkd->bqd"}> : () -> ()
    %cst_75 = arith.constant dense<0.000000e+00> : vector<1x8x8xf32>
    %170 = tpu.matmul %169, %157, %cst_75 {dimension_numbers = #tpu.dot_dimension_numbers<[2], [1], [1], [2], [0, 0, 0, 1, 1, 2], [0], [0]>} : vector<1x8x8xf32>, vector<1x8x8xf32>, vector<1x8x8xf32> -> vector<1x8x8xf32>
    "tpu.trace_stop"() : () -> ()
    %c120 = arith.constant 120 : index
    %c0_76 = arith.constant 0 : index
    %171 = vector.load %arg2[%c120, %c0_76] : memref<216x32xf32, #tpu.memory_space<vmem>>, vector<8x32xf32>
    %172 = vector.shape_cast %170 : vector<1x8x8xf32> to vector<8x8xf32>
    %cst_77 = arith.constant dense<0.000000e+00> : vector<8x32xf32>
    %173 = tpu.matmul %172, %171, %cst_77 {dimension_numbers = #tpu.dot_dimension_numbers<[1], [0], [0], [1], [0, 0, 1, 1], [], []>} : vector<8x8xf32>, vector<8x32xf32>, vector<8x32xf32> -> vector<8x32xf32>
    %174 = arith.addf %137, %173 : vector<8x32xf32>
    %c204 = arith.constant 204 : index
    %c0_78 = arith.constant 0 : index
    %175 = vector.load %arg2[%c204, %c0_78] : memref<216x32xf32, #tpu.memory_space<vmem>>, vector<1x32xf32>
    %176 = vector.broadcast %175 : vector<1x32xf32> to vector<8x32xf32>
    %177 = arith.addf %174, %176 : vector<8x32xf32>
    %178 = arith.addf %1, %177 : vector<8x32xf32>
    %c209 = arith.constant 209 : index
    %c0_79 = arith.constant 0 : index
    %179 = vector.load %arg2[%c209, %c0_79] : memref<216x32xf32, #tpu.memory_space<vmem>>, vector<1x32xf32>
    %c210 = arith.constant 210 : index
    %c0_80 = arith.constant 0 : index
    %180 = vector.load %arg2[%c210, %c0_80] : memref<216x32xf32, #tpu.memory_space<vmem>>, vector<1x32xf32>
    %cst_81 = arith.constant dense<0.000000e+00> : vector<8xf32>
    %181 = vector.multi_reduction <add>, %178, %cst_81 [1] : vector<8x32xf32> to vector<8xf32>
    %182 = vector.shape_cast %181 : vector<8xf32> to vector<8x1xf32>
    %cst_82 = arith.constant 3.200000e+01 : f32
    %183 = vector.broadcast %cst_82 : f32 to vector<8x1xf32>
    %184 = arith.divf %182, %183 : vector<8x1xf32>
    %185 = vector.broadcast %184 : vector<8x1xf32> to vector<8x32xf32>
    %186 = arith.subf %178, %185 : vector<8x32xf32>
    %187 = arith.mulf %186, %186 : vector<8x32xf32>
    %cst_83 = arith.constant dense<0.000000e+00> : vector<8xf32>
    %188 = vector.multi_reduction <add>, %187, %cst_83 [1] : vector<8x32xf32> to vector<8xf32>
    %189 = vector.shape_cast %188 : vector<8xf32> to vector<8x1xf32>
    %cst_84 = arith.constant 3.200000e+01 : f32
    %190 = vector.broadcast %cst_84 : f32 to vector<8x1xf32>
    %191 = arith.divf %189, %190 : vector<8x1xf32>
    %192 = vector.broadcast %184 : vector<8x1xf32> to vector<8x32xf32>
    %193 = arith.subf %178, %192 : vector<8x32xf32>
    %cst_85 = arith.constant 9.99999974E-6 : f32
    %194 = vector.broadcast %cst_85 : f32 to vector<8x1xf32>
    %195 = arith.addf %191, %194 : vector<8x1xf32>
    %196 = math.rsqrt %195 : vector<8x1xf32>
    %197 = vector.broadcast %196 : vector<8x1xf32> to vector<8x32xf32>
    %198 = arith.mulf %193, %197 : vector<8x32xf32>
    %199 = vector.broadcast %179 : vector<1x32xf32> to vector<8x32xf32>
    %200 = arith.mulf %198, %199 : vector<8x32xf32>
    %201 = vector.broadcast %180 : vector<1x32xf32> to vector<8x32xf32>
    %202 = arith.addf %200, %201 : vector<8x32xf32>
    %c128 = arith.constant 128 : index
    %c0_86 = arith.constant 0 : index
    %203 = vector.load %arg2[%c128, %c0_86] : memref<216x32xf32, #tpu.memory_space<vmem>>, vector<32x32xf32>
    %c160 = arith.constant 160 : index
    %c0_87 = arith.constant 0 : index
    %204 = vector.load %arg2[%c160, %c0_87] : memref<216x32xf32, #tpu.memory_space<vmem>>, vector<32x32xf32>
    %cst_88 = arith.constant dense<0.000000e+00> : vector<8x32xf32>
    %205 = tpu.matmul %202, %203, %cst_88 {dimension_numbers = #tpu.dot_dimension_numbers<[1], [0], [0], [1], [0, 0, 1, 1], [], []>} : vector<8x32xf32>, vector<32x32xf32>, vector<8x32xf32> -> vector<8x32xf32>
    %c205 = arith.constant 205 : index
    %c0_89 = arith.constant 0 : index
    %206 = vector.load %arg2[%c205, %c0_89] : memref<216x32xf32, #tpu.memory_space<vmem>>, vector<1x32xf32>
    %207 = vector.broadcast %206 : vector<1x32xf32> to vector<8x32xf32>
    %208 = arith.addf %205, %207 : vector<8x32xf32>
    %cst_90 = arith.constant 0.000000e+00 : f32
    %209 = vector.broadcast %cst_90 : f32 to vector<8x32xf32>
    %210 = arith.maximumf %208, %209 : vector<8x32xf32>
    %cst_91 = arith.constant dense<0.000000e+00> : vector<8x32xf32>
    %211 = tpu.matmul %210, %204, %cst_91 {dimension_numbers = #tpu.dot_dimension_numbers<[1], [0], [0], [1], [0, 0, 1, 1], [], []>} : vector<8x32xf32>, vector<32x32xf32>, vector<8x32xf32> -> vector<8x32xf32>
    %c206 = arith.constant 206 : index
    %c0_92 = arith.constant 0 : index
    %212 = vector.load %arg2[%c206, %c0_92] : memref<216x32xf32, #tpu.memory_space<vmem>>, vector<1x32xf32>
    %213 = vector.broadcast %212 : vector<1x32xf32> to vector<8x32xf32>
    %214 = arith.addf %211, %213 : vector<8x32xf32>
    %215 = arith.addf %178, %214 : vector<8x32xf32>
    %216 = vector.shape_cast %215 : vector<8x32xf32> to vector<1x8x32xf32>
    %c0_93 = arith.constant 0 : index
    %c0_94 = arith.constant 0 : index
    %c0_95 = arith.constant 0 : index
    %217 = vector.load %arg3[%c0_93, %c0_94, %c0_95] : memref<1x8x32xf32, #tpu.memory_space<vmem>>, vector<1x8x32xf32>
    tpu.vector_store %arg3[%c0_93, %c0_94, %c0_95], %216 {strides = array<i32>} : memref<1x8x32xf32, #tpu.memory_space<vmem>>, vector<1x8x32xf32>,
    return
  }
  func.func @transform_0(%arg0: i32) -> (i32, i32, i32) {
    %c0_i32 = arith.constant 0 : i32
    %c0_i32_0 = arith.constant 0 : i32
    %c0_i32_1 = arith.constant 0 : i32
    return %arg0, %c0_i32, %c0_i32_0 : i32, i32, i32
  }
  func.func @transform_1(%arg0: i32) -> (i32, i32) {
    %c0_i32 = arith.constant 0 : i32
    %c0_i32_0 = arith.constant 0 : i32
    %c0_i32_1 = arith.constant 0 : i32
    return %c0_i32, %c0_i32_0 : i32, i32
  }
  func.func @transform_2(%arg0: i32) -> (i32, i32, i32) {
    %c0_i32 = arith.constant 0 : i32
    %c0_i32_0 = arith.constant 0 : i32
    %c0_i32_1 = arith.constant 0 : i32
    return %arg0, %c0_i32, %c0_i32_0 : i32, i32, i32
  }
}

</mosaic_0001>

<bundles_post_ra>
// kernel: tpu_custom_call.1
= control target key start
LH: loop header
LB: loop body
LE: loop exit
PB: predicated region body
PF: predicated region fallthrough
CT: control target
= control target key end

     0   :  { %7 = vsyncpa [#allocation3], 0  ;;  %s3126_s0 = inlined_call_operand.vmem [shape: f32[2,8,32], index: 0, kind: input, shape index: {}]   ;;  %s3127_s1 = inlined_call_operand.vmem [shape: f32[216,32], index: 1, kind: input, shape index: {}]   ;;  %s3128_s2 = inlined_call_operand.hbm [shape: f32[2,8,32], index: 2, kind: output, shape index: {}]  }
   0x1   :  { %9 = vsyncpa [#allocation3 + $0x1], 0  ;;  %s2749_s9 = smov 0   ;;  %s2751_s10 = smov 0  }
   0x2   :  { %s2753_s11 = smov 0   ;;  %s2755_s12 = smov 0  }
   0x3 LB: > { %s2770_s13 = sadd.s32 4294967295, %s2729_s12   ;;  %s2337_s14 = sadd.s32 4294967294, %s2729_s12   ;;  %s2729_s12 = sphi %s2755_s12, %s3134_s12   ;;  %s2725_s11 = sphi %s2753_s11, %s3133_s11   ;;  %s2721_s10 = sphi %s2751_s10, %s3132_s10   ;;  %s2717_s9 = sphi %s2749_s9, %s3131_s9  }
   0x4   : > { %s2774_s15 = sadd.s32 1, %s2729_s12   ;;  %s69_s16 = sadd.s32 1, %s2725_s11 }
   0x5   : > { %s66_s17 = ssub.s32 %s2729_s12, %s2774_s15  ;;  %p79_p0 = scmp.ne.s32.totalorder %s2725_s11, %s2721_s10 }
   0x6   : > { %p67_p1 = scmp.eq.s32.totalorder %s66_s17, 0  ;;  %p80_p2 = scmp.eq.s32.totalorder %s2770_s13, 1 }
   0x7   : > { %p85_p3 = scmp.ne.s32.totalorder %s2721_s10, %s2717_s9  ;;  %p86_p4 = scmp.eq.s32.totalorder %s2337_s14, 1 }
   0x8   : > { %s2785_s18 = scalar_select %p67_p1, %s2725_s11, %s69_s16  }
   0x9   : > { %p2787_p5 = por %p80_p2, %p79_p0  ;;  %p2791_p6 = por %p86_p4, %p85_p3 }
   0xa   : > { %p2340_p7 = scmp.ge.s32.totalorder %s2729_s12, 1  ;;  %p114_p8 = scmp.lt.s32.totalorder %s2729_s12, 3 }
   0xc   : > { %p115_p9 = pnand %p2340_p7, %p114_p8 }
   0xd   : > { %p135_p10 = scmp.lt.s32.totalorder (!%p115_p9), %s2770_s13, 1  ;;  %s132_s6 = sand.u32 (!%p115_p9), 1, %s2721_s10  }
   0xe   : > { %118 = sbr.rel (%p115_p9) target bundleno = 4648 (0x1228), region = 28  ;;  %s2341_s7 = sshll.u32 (!%p115_p9), %s132_s6, 3 }
   0xf   : > { %s2405_s16 = sshll.u32 (!%p115_p9), %s2770_s13, 7  ;;  %s134_s17 = scalar_lea.vmem (!%p115_p9), [#allocation2], %s2341_s7 }
  0x10   : > { %s2276_s24 = scalar_lea.hbm (!%p115_p9), %s3128_s2, %s2405_s16  ;;  %s2733_s27 = smov (!%p115_p9), [#allocation2]  }
  0x13   : > { %s136_s21 = scalar_select %p135_p10, %s2770_s13, 1  ;;  %vm142_vm0 = vcmask 261120   ;;  %v2731_v7 = vmov 0.0   ;;  %v167_v8 = vld [vmem:[%s3127_s1] sm:$0xff]  ;;  %vm2732_vm1 = vmmov 0   ;;  %vm408_vm2 = vcmask 64512  }
  0x14   : > { %2466 = vmatprep.subr.mxu0 %v2731_v7  ;;  %2471 = vmatprep.subr.mxu1 %v2731_v7  ;;  %v168_v9 = vld [vmem:[%s3127_s1 + $0x20] sm:$0xff]  ;;  %v2343_v14 = vld [vmem:[%s3127_s1 + $0xcf] ss:$0 sm:$0xff]  ;;  %v2344_v16 = vld [vmem:[%s3127_s1 + $0xd0] ss:$0 sm:$0xff]  ;;  %s2673_s13 = sshll.u32 %s2733_s27, 4  ;;  %s2674_s13 = int_to_ptr.vmem [resolvable:$false] %s2673_s13 }
  0x15   : > { %s2342_s22 = sshll.u32 %s136_s21, 3  ;;  %2467 = vmatpush3.xpose.msk.msra.mxu0 %vm142_vm0, %v167_v8  ;;  %2472 = vmatpush3.xpose.msk.msra.mxu1 %vm142_vm0, %v168_v9  ;;  %v169_v19 = vld [vmem:[%s3127_s1 + $0x40] sm:$0xff]  ;;  %v2351_v28 = vld [vmem:[%s3127_s1 + $0xc8] ss:$0 sm:$0xff]  ;;  %v2363_v40 = vld [vmem:[%s3127_s1 + $0xc9] ss:$0 sm:$0xff] }
  0x16   : > { %s138_s25 = scalar_lea.vmem %s3126_s0, %s2342_s22  ;;  %2476 = vmatprep.subr.mxu0 %v2731_v7  ;;  %2481 = vmatprep.subr.mxu1 %v2731_v7  ;;  %v2345_v20 = vld [vmem:[%s3127_s1 + $0xc0] ss:$0 sm:$0xff]  ;;  %v2348_v21 = vld [vmem:[%s3127_s1 + $0xc4] ss:$0 sm:$0xff]  ;;  %v571_v31 = vld [vmem:[%s3127_s1 + $0x8] sm:$0xff]  ;;  %s2278_s21 = sshll.u32 %s134_s17, 4  ;;  %s2279_s21 = int_to_ptr.vmem [resolvable:$true] %s2278_s21 }
  0x17   : > { %v2802_v0 = vld [vmem:[%s138_s25] sm:$0xff]  ;;  %2468 = vmatprep.mubr.msk.f32.mxu0 %vm2732_vm1, %v2731_v7  ;;  %2473 = vmatprep.mubr.msk.f32.mxu1 %vm2732_vm1, %v2731_v7  ;;  %v573_v34 = vld [vmem:[%s3127_s1 + $0x48] sm:$0xff]  ;;  %s2265_s25 = scalar_lea.sflag [#allocation3], %s132_s6  ;;  %s2669_s26 = scalar_lea.vmem %s2279_s21, 128 }
  0x18   : > { %v143_v1 = vsel %vm142_vm0, %v2802_v0, 0.0  ;;  %v572_v52 = vld [vmem:[%s3127_s1 + $0x28] sm:$0xff]  ;;  %v2357_v54 = vld [vmem:[%s3127_s1 + $0xc1] ss:$0 sm:$0xff]  ;;  %v2360_v56 = vld [vmem:[%s3127_s1 + $0xc5] ss:$0 sm:$0xff]  ;;  %p2670_p11 = scmp.ne.s32.totalorder %s2279_s21, %s2669_s26  ;;  %p2676_p0 = scmp.lt.s32.totalorder %s2279_s21, %s2674_s13 }
  0x19   : > { %144 = vadd.xlane.f32.xlu0 %v143_v1  ;;  %v970_v8 = vld [vmem:[%s3127_s1 + $0x68] sm:$0xff]  ;;  %s2675_s28 = scalar_lea.vmem %s2674_s13, 256 }
  0x1a   : > { %p2671_p12 = pnand %p2670_p11, %p2787_p5  ;;  %p2677_p1 = scmp.lt.s32.totalorder %s2675_s28, %s2669_s26 }
  0x1c   : > { %p2672_p13 = pneg %p2671_p12  ;;  %p2678_p2 = por %p2677_p1, %p2676_p0 }
  0x1e   : > { %p2679_p3 = pnand %p2678_p2, %p2672_p13 }
  0xa2   : > { %v145_v2 = vpop.xlane.xlu0 %144 }
  0xa3   : > { %v147_v3 = vmul.f32 0.03125, %v145_v2 }
  0xa5   : > { %v148_v4 = vsub.f32 %v2802_v0, %v147_v3 }
  0xa7   : > { %v149_v5 = vmul.f32 %v148_v4, %v148_v4 }
  0xa9   : > { %v150_v6 = vsel %vm142_vm0, %v149_v5, 0.0 }
  0xaa   : > { %151 = vadd.xlane.f32.xlu0 %v150_v6 }
 0x133   : > { %v152_v10 = vpop.xlane.xlu0 %151 }
 0x134   : > { %v153_v11 = vmul.f32 0.03125, %v152_v10 }
 0x136   : > { %v154_v12 = vadd.f32 1e-05, %v153_v11 }
 0x138   : > { %2649 = vrsqrt.f32 %v154_v12  ;;  %v570_v12 = vld [vmem:[%s3127_s1 + $0x60] sm:$0xff] }
 0x145   : > { %v2650_v13 = vpop.eup %2649 }
 0x146   : > { %v156_v15 = vmul.f32 %v2650_v13, %v148_v4  ;;  %v1118_v13 = vld [vmem:[%s3127_s1 + $0x30] sm:$0xff] }
 0x148   : > { %v161_v17 = vmul.f32 %v2343_v14, %v156_v15  ;;  %v1117_v14 = vld [vmem:[%s3127_s1 + $0x10] sm:$0xff] }
 0x14a   : > { %v2830_v18 = vadd.f32 %v2344_v16, %v161_v17  ;;  %v1119_v17 = vld [vmem:[%s3127_s1 + $0x50] sm:$0xff] }
 0x14c   : > { %2469 = vmatmul.mubr.msk.f32.vlgmr.msra.gmra.mxu0 %vm142_vm0, %v2830_v18  ;;  %2474 = vmatmul.mubr.msk.f32.vlgmr.msra.gmra.mxu1 %vm142_vm0, %v2830_v18 }
 0x14d   : > { %2477 = vmatpush3.xpose.msk.msra.mxu0 %vm142_vm0, %v169_v19  ;;  %2478 = vmatprep.mubr.msk.f32.mxu0 %vm2732_vm1, %v2731_v7 }
 0x14e   : > { %2483 = vmatprep.mubr.msk.f32.mxu1 %vm2732_vm1, %v2731_v7  ;;  %2486 = vmatprep.subr.mxu0 %v2731_v7 }
 0x150   : > { %2479 = vmatmul.mubr.msk.f32.vlgmr.msra.gmra.mxu0 %vm142_vm0, %v2830_v18 }
 0x151   : > { %2488 = vmatprep.mubr.msk.f32.mxu0 %vm2732_vm1, %v2731_v7 }
 0x20c   : > { %v249_v22 = vpop.f32.mrf.mxu0  ;;  %v327_v23 = vpop.f32.mrf.mxu1 }
 0x20d   : > { %v250_v24 = vadd.f32 %v2345_v20, %v249_v22  ;;  %v328_v25 = vadd.f32 %v2348_v21, %v327_v23  ;;  %v2374_v21 = vld [vmem:[%s3127_s1 + $0xc6] ss:$0 sm:$0xff] }
 0x20e   : > { %v2470_v26 = vpop.f32.mrf.mxu0  ;;  %v2475_v27 = vpop.f32.mrf.mxu1 }
 0x20f   : > { %v253_v29 = vmul.f32 0.35355338, %v250_v24  ;;  %2482 = vmatpush3.xpose.msk.msra.mxu1 %vm408_vm2, %v328_v25  ;;  %v2371_v27 = vld [vmem:[%s3127_s1 + $0xc2] ss:$0 sm:$0xff] }
 0x210   : > { %v404_v30 = vpop.f32.mrf.mxu0  ;;  %2491 = vmatprep.subr.mxu1 %v2731_v7 }
 0x211   : > { %v405_v32 = vadd.f32 %v2351_v28, %v404_v30 }
 0x212   : > { %v2480_v33 = vpop.f32.mrf.mxu0  ;;  %2484 = vmatmul.mubr.msk.f32.vlgmr.msra.gmra.mxu1 %vm408_vm2, %v253_v29 }
 0x213   : > { %2487 = vmatpush3.msra.mxu0 %v405_v32  ;;  %2492 = vmatpush3.xpose.msk.msra.mxu1 %vm142_vm0, %v571_v31  ;;  %v2377_v31 = vld [vmem:[%s3127_s1 + $0xca] ss:$0 sm:$0xff] }
 0x214   : > { %2493 = vmatprep.mubr.msk.f32.mxu1 %vm2732_vm1, %v2731_v7  ;;  %2501 = vmatprep.subr.mxu1 %v2731_v7 }
 0x215   : > { %2496 = vmatprep.subr.mxu0 %v2731_v7 }
 0x216   : > { %2494 = vmatmul.mubr.msk.f32.vlgmr.msra.gmra.mxu1 %vm142_vm0, %v2830_v18 }
 0x217   : > { %2502 = vmatpush3.xpose.msk.msra.mxu1 %vm142_vm0, %v573_v34  ;;  %2503 = vmatprep.mubr.msk.f32.mxu1 %vm2732_vm1, %v2731_v7 }
 0x218   : > { %2511 = vmatprep.subr.mxu1 %v2731_v7 }
 0x21a   : > { %2504 = vmatmul.mubr.msk.f32.vlgmr.msra.gmra.mxu1 %vm142_vm0, %v2830_v18 }
 0x21b   : > { %2513 = vmatprep.mubr.msk.f32.mxu1 %vm2732_vm1, %v2731_v7 }
 0x2d2   : > { %v481_v35 = vpop.f32.mrf.mxu1 }
 0x2d3   : > { %v485_v36 = vsel %vm408_vm2, %v481_v35, -inf }
 0x2d4   : > { %486 = vmax.xlane.f32.xlu1 %v485_v36  ;;  %v2485_v37 = vpop.f32.mrf.mxu1 }
 0x2d6   : > { %v650_v38 = vpop.f32.mrf.mxu1 }
 0x2d7   : > { %v651_v57 = vadd.f32 %v2357_v54, %v650_v38 }
 0x2d8   : > { %v2495_v39 = vpop.f32.mrf.mxu1 }
 0x2d9   : > { %v654_v61 = vmul.f32 0.35355338, %v651_v57 }
 0x2da   : > { %v805_v41 = vpop.f32.mrf.mxu1 }
 0x2db   : > { %v806_v42 = vadd.f32 %v2363_v40, %v805_v41 }
 0x2dc   : > { %v2505_v43 = vpop.f32.mrf.mxu1 }
 0x2dd   : > { %2512 = vmatpush3.msra.mxu1 %v806_v42 }
 0x2de   : > { %2521 = vmatprep.subr.mxu1 %v2731_v7 }
 0x35d   : > { %v487_v44 = vpop.xlane.xlu1 %486 }
 0x35e   : > { %v488_v45 = vsub.f32 %v481_v35, %v487_v44  ;;  %v1516_v44 = vld [vmem:[%s3127_s1 + $0x70] sm:$0xff] }
 0x360   : > { %v489_v46 = vmul.f32 1.442695, %v488_v45 }
 0x362   : > { %2651 = vpow2.f32 %v489_v46 }
 0x36f   : > { %v2652_v47 = vpop.eup %2651 }
 0x370   : > { %v491_v48 = vsel %vm408_vm2, %v2652_v47, 0.0 }
 0x371   : > { %492 = vadd.xlane.f32.xlu1 %v491_v48  ;;  %v1591_v48 = vld [vmem:[%s3127_s1 + $0x18] sm:$0xff] }
 0x3fa   : > { %v493_v49 = vpop.xlane.xlu1 %492 }
 0x3fb   : > { %2653 = vrcp.f32 %v493_v49  ;;  %v1593_v49 = vld [vmem:[%s3127_s1 + $0x58] sm:$0xff] }
 0x408   : > { %v2654_v50 = vpop.eup %2653 }
 0x409   : > { %v496_v51 = vmul.f32 %v2654_v50, %v2652_v47  ;;  %v1592_v50 = vld [vmem:[%s3127_s1 + $0x38] sm:$0xff] }
 0x40b   : > { %2489 = vmatmul.mubr.msk.f32.vlgmr.msra.gmra.mxu0 %vm408_vm2, %v496_v51 }
 0x40c   : > { %2497 = vmatpush3.xpose.msk.msra.mxu0 %vm142_vm0, %v572_v52  ;;  %2498 = vmatprep.mubr.msk.f32.mxu0 %vm2732_vm1, %v2731_v7 }
 0x40d   : > { %2506 = vmatprep.subr.mxu0 %v2731_v7 }
 0x40f   : > { %2499 = vmatmul.mubr.msk.f32.vlgmr.msra.gmra.mxu0 %vm142_vm0, %v2830_v18 }
 0x410   : > { %2508 = vmatprep.mubr.msk.f32.mxu0 %vm2732_vm1, %v2731_v7 }
 0x4cb   : > { %v566_v53 = vpop.f32.mrf.mxu0 }
 0x4cd   : > { %v2490_v55 = vpop.f32.mrf.mxu0 }
 0x4ce   : > { %v2390_v55 = vld [vmem:[%s3127_s1 + $0xcb] ss:$0 sm:$0xff] }
 0x4cf   : > { %v728_v58 = vpop.f32.mrf.mxu0 }
 0x4d0   : > { %v729_v59 = vadd.f32 %v2360_v56, %v728_v58 }
 0x4d1   : > { %v2500_v60 = vpop.f32.mrf.mxu0 }
 0x4d2   : > { %2507 = vmatpush3.xpose.msk.msra.mxu0 %vm408_vm2, %v729_v59 }
 0x4d3   : > { %2516 = vmatprep.subr.mxu0 %v2731_v7 }
 0x4d5   : > { %2509 = vmatmul.mubr.msk.f32.vlgmr.msra.gmra.mxu0 %vm408_vm2, %v654_v61 }
 0x4d6   : > { %2518 = vmatprep.mubr.msk.f32.mxu0 %vm2732_vm1, %v2731_v7  ;;  %2517 = vmatpush3.msra.mxu0 %v970_v8 }
 0x4d7   : > { %2526 = vmatprep.subr.mxu0 %v2731_v7 }
 0x595   : > { %v881_v62 = vpop.f32.mrf.mxu0 }
 0x596   : > { %v885_v63 = vsel %vm408_vm2, %v881_v62, -inf }
 0x597   : > { %886 = vmax.xlane.f32.xlu0 %v885_v63  ;;  %v2510_v1 = vpop.f32.mrf.mxu0  ;;  %v2387_v63 = vld [vmem:[%s3127_s1 + $0xc7] ss:$0 sm:$0xff] }
 0x620   : > { %v887_v2 = vpop.xlane.xlu0 %886 }
 0x621   : > { %v888_v3 = vsub.f32 %v881_v62, %v887_v2 }
 0x623   : > { %v889_v4 = vmul.f32 1.442695, %v888_v3 }
 0x625   : > { %2655 = vpow2.f32 %v889_v4 }
 0x632   : > { %v2656_v5 = vpop.eup %2655 }
 0x633   : > { %v891_v6 = vsel %vm408_vm2, %v2656_v5, 0.0 }
 0x634   : > { %892 = vadd.xlane.f32.xlu1 %v891_v6 }
 0x6bd   : > { %v893_v9 = vpop.xlane.xlu1 %892 }
 0x6be   : > { %2657 = vrcp.f32 %v893_v9 }
 0x6cb   : > { %v2658_v10 = vpop.eup %2657 }
 0x6cc   : > { %v896_v11 = vmul.f32 %v2658_v10, %v2656_v5 }
 0x6ce   : > { %2514 = vmatmul.mubr.msk.f32.vlgmr.msra.gmra.mxu1 %vm408_vm2, %v896_v11 }
 0x6cf   : > { %2522 = vmatpush3.msra.mxu1 %v570_v12  ;;  %2523 = vmatprep.mubr.msk.f32.mxu1 %vm2732_vm1, %v2731_v7 }
 0x6d0   : > { %2531 = vmatprep.subr.mxu1 %v2731_v7 }
 0x6d2   : > { %2524 = vmatmul.mubr.msk.f32.vlgmr.msra.gmra.mxu1 %vm408_vm2, %v566_v53 }
 0x6d3   : > { %2532 = vmatpush3.xpose.msk.msra.mxu1 %vm142_vm0, %v1118_v13  ;;  %2533 = vmatprep.mubr.msk.f32.mxu1 %vm2732_vm1, %v2731_v7 }
 0x6d4   : > { %2541 = vmatprep.subr.mxu1 %v2731_v7 }
 0x6d6   : > { %2534 = vmatmul.mubr.msk.f32.vlgmr.msra.gmra.mxu1 %vm142_vm0, %v2830_v18 }
 0x6d7   : > { %2543 = vmatprep.mubr.msk.f32.mxu1 %vm2732_vm1, %v2731_v7 }
 0x78e   : > { %v966_v15 = vpop.f32.mrf.mxu1 }
 0x78f   : > { %2519 = vmatmul.mubr.msk.f32.vlgmr.msra.gmra.mxu0 %vm408_vm2, %v966_v15  ;;  %v1990_v15 = vld [vmem:[%s3127_s1 + $0x78] sm:$0xff] }
 0x790   : > { %v2515_v16 = vpop.f32.mrf.mxu1  ;;  %2527 = vmatpush3.xpose.msk.msra.mxu0 %vm142_vm0, %v1117_v14  ;;  %2528 = vmatprep.mubr.msk.f32.mxu0 %vm2732_vm1, %v2731_v7 }
 0x791   : > { %2536 = vmatprep.subr.mxu0 %v2731_v7 }
 0x792   : > { %v2947_v19 = vpop.f32.mrf.mxu1 }
 0x793   : > { %2529 = vmatmul.mubr.msk.f32.vlgmr.msra.gmra.mxu0 %vm142_vm0, %v2830_v18 }
 0x794   : > { %v2525_v20 = vpop.f32.mrf.mxu1  ;;  %2537 = vmatpush3.xpose.msk.msra.mxu0 %vm142_vm0, %v1119_v17  ;;  %2538 = vmatprep.mubr.msk.f32.mxu0 %vm2732_vm1, %v2731_v7 }
 0x795   : > { %2546 = vmatprep.subr.mxu0 %v2731_v7 }
 0x796   : > { %v1274_v22 = vpop.f32.mrf.mxu1 }
 0x797   : > { %v1275_v23 = vadd.f32 %v2374_v21, %v1274_v22  ;;  %2539 = vmatmul.mubr.msk.f32.vlgmr.msra.gmra.mxu0 %vm142_vm0, %v2830_v18 }
 0x798   : > { %v2535_v24 = vpop.f32.mrf.mxu1  ;;  %2548 = vmatprep.mubr.msk.f32.mxu0 %vm2732_vm1, %v2731_v7 }
 0x799   : > { %2542 = vmatpush3.xpose.msk.msra.mxu1 %vm408_vm2, %v1275_v23  ;;  %v2397_v23 = vld [vmem:[%s3127_s1 + $0xcc] ss:$0 sm:$0xff] }
 0x79a   : > { %2551 = vmatprep.subr.mxu1 %v2731_v7 }
 0x84f   : > { %v1040_v25 = vpop.f32.mrf.mxu0 }
 0x850   : > { %v1114_v59 = vadd.f32 %v2947_v19, %v1040_v25 }
 0x851   : > { %v2520_v26 = vpop.f32.mrf.mxu0 }
 0x853   : > { %v1196_v28 = vpop.f32.mrf.mxu0 }
 0x854   : > { %v1197_v29 = vadd.f32 %v2371_v27, %v1196_v28 }
 0x855   : > { %v2530_v30 = vpop.f32.mrf.mxu0 }
 0x856   : > { %v1200_v32 = vmul.f32 0.35355338, %v1197_v29 }
 0x857   : > { %v1351_v33 = vpop.f32.mrf.mxu0 }
 0x858   : > { %v1352_v34 = vadd.f32 %v2377_v31, %v1351_v33  ;;  %2544 = vmatmul.mubr.msk.f32.vlgmr.msra.gmra.mxu1 %vm408_vm2, %v1200_v32 }
 0x859   : > { %v2540_v35 = vpop.f32.mrf.mxu0  ;;  %2553 = vmatprep.mubr.msk.f32.mxu1 %vm2732_vm1, %v2731_v7  ;;  %2552 = vmatpush3.msra.mxu1 %v1516_v44  ;;  %v2399_v44 = vld [vmem:[%s3127_s1 + $0xd2] ss:$0 sm:$0xff] }
 0x85a   : > { %2547 = vmatpush3.msra.mxu0 %v1352_v34  ;;  %2561 = vmatprep.subr.mxu1 %v2731_v7  ;;  %v2100_v34 = vld [vmem:[%s3127_s1 + $0x98] sm:$0xff]  ;;  %v2098_v35 = vld [vmem:[%s3127_s1 + $0x88] sm:$0xff] }
 0x85b   : > { %2556 = vmatprep.subr.mxu0 %v2731_v7 }
 0x918   : > { %v1427_v36 = vpop.f32.mrf.mxu1 }
 0x919   : > { %v1431_v37 = vsel %vm408_vm2, %v1427_v36, -inf }
 0x91a   : > { %1432 = vmax.xlane.f32.xlu0 %v1431_v37  ;;  %v2545_v38 = vpop.f32.mrf.mxu1  ;;  %v2104_v37 = vld [vmem:[%s3127_s1 + $0xb8] sm:$0xff] }
 0x9a3   : > { %v1433_v39 = vpop.xlane.xlu0 %1432 }
 0x9a4   : > { %v1434_v40 = vsub.f32 %v1427_v36, %v1433_v39  ;;  %v2097_v36 = vld [vmem:[%s3127_s1 + $0x80] sm:$0xff] }
 0x9a6   : > { %v1435_v41 = vmul.f32 1.442695, %v1434_v40 }
 0x9a8   : > { %2659 = vpow2.f32 %v1435_v41 }
 0x9b5   : > { %v2660_v42 = vpop.eup %2659 }
 0x9b6   : > { %v1437_v43 = vsel %vm408_vm2, %v2660_v42, 0.0 }
 0x9b7   : > { %1438 = vadd.xlane.f32.xlu1 %v1437_v43 }
 0xa40   : > { %v1439_v45 = vpop.xlane.xlu1 %1438 }
 0xa41   : > { %2661 = vrcp.f32 %v1439_v45 }
 0xa4e   : > { %v2662_v46 = vpop.eup %2661 }
 0xa4f   : > { %v1442_v47 = vmul.f32 %v2662_v46, %v2660_v42  ;;  %v2398_v42 = vld [vmem:[%s3127_s1 + $0xd1] ss:$0 sm:$0xff] }
 0xa51   : > { %2549 = vmatmul.mubr.msk.f32.vlgmr.msra.gmra.mxu0 %vm408_vm2, %v1442_v47  ;;  %v2103_v47 = vld [vmem:[%s3127_s1 + $0xb0] sm:$0xff] }
 0xa52   : > { %2557 = vmatpush3.xpose.msk.msra.mxu0 %vm142_vm0, %v1591_v48  ;;  %2558 = vmatprep.mubr.msk.f32.mxu0 %vm2732_vm1, %v2731_v7  ;;  %v2102_v48 = vld [vmem:[%s3127_s1 + $0xa8] sm:$0xff] }
 0xa53   : > { %2566 = vmatprep.subr.mxu0 %v2731_v7 }
 0xa55   : > { %2559 = vmatmul.mubr.msk.f32.vlgmr.msra.gmra.mxu0 %vm142_vm0, %v2830_v18 }
 0xa56   : > { %2567 = vmatpush3.xpose.msk.msra.mxu0 %vm142_vm0, %v1593_v49  ;;  %2568 = vmatprep.mubr.msk.f32.mxu0 %vm2732_vm1, %v2731_v7  ;;  %v2101_v49 = vld [vmem:[%s3127_s1 + $0xa0] sm:$0xff] }
 0xa57   : > { %2576 = vmatprep.subr.mxu0 %v2731_v7 }
 0xa59   : > { %2569 = vmatmul.mubr.msk.f32.vlgmr.msra.gmra.mxu0 %vm142_vm0, %v2830_v18 }
 0xa5a   : > { %2578 = vmatprep.mubr.msk.f32.mxu0 %vm2732_vm1, %v2731_v7 }
 0xb11   : > { %v1512_v51 = vpop.f32.mrf.mxu0 }
 0xb12   : > { %2554 = vmatmul.mubr.msk.f32.vlgmr.msra.gmra.mxu1 %vm408_vm2, %v1512_v51 }
 0xb13   : > { %v2550_v52 = vpop.f32.mrf.mxu0  ;;  %2562 = vmatpush3.xpose.msk.msra.mxu1 %vm142_vm0, %v1592_v50  ;;  %2563 = vmatprep.mubr.msk.f32.mxu1 %vm2732_vm1, %v2731_v7  ;;  %v2400_v50 = vld [vmem:[%s3127_s1 + $0xcd] ss:$0 sm:$0xff] }
 0xb14   : > { %2571 = vmatprep.subr.mxu1 %v2731_v7 }
 0xb15   : > { %v1670_v53 = vpop.f32.mrf.mxu0 }
 0xb16   : > { %2564 = vmatmul.mubr.msk.f32.vlgmr.msra.gmra.mxu1 %vm142_vm0, %v2830_v18  ;;  %v2384_v18 = vld [vmem:[%s3127_s1 + $0xc3] ss:$0 sm:$0xff] }
 0xb17   : > { %v2560_v54 = vpop.f32.mrf.mxu0  ;;  %2573 = vmatprep.mubr.msk.f32.mxu1 %vm2732_vm1, %v2731_v7  ;;  %v1671_v1 = vadd.f32 %v2384_v18, %v1670_v53 }
 0xb19   : > { %v1825_v56 = vpop.f32.mrf.mxu0  ;;  %v1674_v5 = vmul.f32 0.35355338, %v1671_v1 }
 0xb1a   : > { %v1826_v57 = vadd.f32 %v2390_v55, %v1825_v56 }
 0xb1b   : > { %v2570_v58 = vpop.f32.mrf.mxu0 }
 0xb1c   : > { %2577 = vmatpush3.msra.mxu0 %v1826_v57 }
 0xb1d   : > { %2586 = vmatprep.subr.mxu0 %v2731_v7 }
 0xbd2   : > { %v1586_v60 = vpop.f32.mrf.mxu1 }
 0xbd3   : > { %v1590_v61 = vadd.f32 %v1586_v60, %v1114_v59 }
 0xbd4   : > { %v2555_v62 = vpop.f32.mrf.mxu1 }
 0xbd6   : > { %v1748_v2 = vpop.f32.mrf.mxu1 }
 0xbd7   : > { %v1749_v3 = vadd.f32 %v2387_v63, %v1748_v2 }
 0xbd8   : > { %v2565_v4 = vpop.f32.mrf.mxu1 }
 0xbd9   : > { %2572 = vmatpush3.xpose.msk.msra.mxu1 %vm408_vm2, %v1749_v3 }
 0xbda   : > { %2581 = vmatprep.subr.mxu1 %v2731_v7 }
 0xbdc   : > { %2574 = vmatmul.mubr.msk.f32.vlgmr.msra.gmra.mxu1 %vm408_vm2, %v1674_v5 }
 0xbdd   : > { %2583 = vmatprep.mubr.msk.f32.mxu1 %vm2732_vm1, %v2731_v7  ;;  %2582 = vmatpush3.msra.mxu1 %v1990_v15 }
 0xbde   : > { %2597 = vmatprep.subr.mxu1 %v2731_v7 }
 0xc9c   : > { %v1901_v6 = vpop.f32.mrf.mxu1 }
 0xc9d   : > { %v1905_v8 = vsel %vm408_vm2, %v1901_v6, -inf }
 0xc9e   : > { %1906 = vmax.xlane.f32.xlu0 %v1905_v8  ;;  %v2575_v9 = vpop.f32.mrf.mxu1 }
 0xd27   : > { %v1907_v10 = vpop.xlane.xlu0 %1906 }
 0xd28   : > { %v1908_v11 = vsub.f32 %v1901_v6, %v1907_v10 }
 0xd2a   : > { %v1909_v12 = vmul.f32 1.442695, %v1908_v11 }
 0xd2c   : > { %2663 = vpow2.f32 %v1909_v12 }
 0xd39   : > { %v2664_v13 = vpop.eup %2663 }
 0xd3a   : > { %v1911_v14 = vsel %vm408_vm2, %v2664_v13, 0.0 }
 0xd3b   : > { %1912 = vadd.xlane.f32.xlu1 %v1911_v14 }
 0xdc4   : > { %v1913_v16 = vpop.xlane.xlu1 %1912 }
 0xdc5   : > { %2665 = vrcp.f32 %v1913_v16 }
 0xdd2   : > { %v2666_v17 = vpop.eup %2665 }
 0xdd3   : > { %v1916_v19 = vmul.f32 %v2666_v17, %v2664_v13 }
 0xdd5   : > { %2579 = vmatmul.mubr.msk.f32.vlgmr.msra.gmra.mxu0 %vm408_vm2, %v1916_v19 }
 0xdd6   : > { %2594 = vmatprep.mubr.msk.f32.mxu0 %vm2732_vm1, %v2731_v7  ;;  %2587 = vmatpush3.msra.mxu0 %v2100_v34 }
 0xdd7   : > { %2588 = vmatprep.subr.mxu0 %v2731_v7 }
 0xe95   : > { %v1986_v20 = vpop.f32.mrf.mxu0 }
 0xe96   : > { %2584 = vmatmul.mubr.msk.f32.vlgmr.msra.gmra.mxu1 %vm408_vm2, %v1986_v20 }
 0xe97   : > { %v2580_v21 = vpop.f32.mrf.mxu0  ;;  %2605 = vmatprep.mubr.msk.f32.mxu1 %vm2732_vm1, %v2731_v7  ;;  %2598 = vmatpush3.msra.mxu1 %v2104_v37 }
 0xe98   : > { %2599 = vmatprep.subr.mxu1 %v2731_v7 }
 0xe99   : > { %2600 = vmatpush3.msra.mxu1 %v2103_v47 }
 0xe9a   : > { %2601 = vmatprep.subr.mxu1 %v2731_v7 }
 0xe9b   : > { %2602 = vmatpush3.msra.mxu1 %v2102_v48 }
 0xe9c   : > { %2603 = vmatprep.subr.mxu1 %v2731_v7 }
 0xe9d   : > { %2604 = vmatpush3.msra.mxu1 %v2101_v49 }
 0xf56   : > { %v2060_v22 = vpop.f32.mrf.mxu1 }
 0xf57   : > { %v2064_v24 = vadd.f32 %v2060_v22, %v1590_v61 }
 0xf58   : > { %v2585_v25 = vpop.f32.mrf.mxu1 }
 0xf59   : > { %v2070_v26 = vadd.f32 %v2397_v23, %v2064_v24 }
 0xf5b   : > { %v2071_v27 = vadd.f32 %v2070_v26, %v2802_v0  ;;  %v2099_v0 = vld [vmem:[%s3127_s1 + $0x90] sm:$0xff] }
 0xf5c   : > { %2589 = vmatpush3.msra.mxu0 %v2099_v0 }
 0xf5d   : > { %v2074_v28 = vsel %vm142_vm0, %v2071_v27, 0.0  ;;  %2590 = vmatprep.subr.mxu0 %v2731_v7 }
 0xf5e   : > { %2075 = vadd.xlane.f32.xlu0 %v2074_v28  ;;  %2591 = vmatpush3.msra.mxu0 %v2098_v35 }
 0xf5f   : > { %2592 = vmatprep.subr.mxu0 %v2731_v7  ;;  %v2402_v7 = vld [vmem:[%s3127_s1 + $0xce] ss:$0 sm:$0xff] }
 0xf60   : > { %2593 = vmatpush3.msra.mxu0 %v2097_v36 }
 0xfe7   : > { %v2076_v29 = vpop.xlane.xlu0 %2075 }
 0xfe8   : > { %v2077_v30 = vmul.f32 0.03125, %v2076_v29 }
 0xfea   : > { %v2078_v31 = vsub.f32 %v2071_v27, %v2077_v30 }
 0xfec   : > { %v2079_v32 = vmul.f32 %v2078_v31, %v2078_v31 }
 0xfee   : > { %v2080_v33 = vsel %vm142_vm0, %v2079_v32, 0.0 }
 0xfef   : > { %2081 = vadd.xlane.f32.xlu1 %v2080_v33 }
0x1078   : > { %v2082_v38 = vpop.xlane.xlu1 %2081 }
0x1079   : > { %v2083_v39 = vmul.f32 0.03125, %v2082_v38 }
0x107b   : > { %v2084_v40 = vadd.f32 1e-05, %v2083_v39 }
0x107d   : > { %2667 = vrsqrt.f32 %v2084_v40 }
0x108a   : > { %v2668_v41 = vpop.eup %2667 }
0x108b   : > { %v2086_v43 = vmul.f32 %v2668_v41, %v2078_v31 }
0x108d   : > { %v2091_v45 = vmul.f32 %v2398_v42, %v2086_v43 }
0x108f   : > { %v2096_v46 = vadd.f32 %v2399_v44, %v2091_v45 }
0x1091   : > { %2595 = vmatmul.mubr.msk.f32.vlgmr.msra.gmra.mxu0 %vm142_vm0, %v2096_v46 }
0x1151   : > { %v2179_v51 = vpop.f32.mrf.mxu0 }
0x1152   : > { %v2180_v52 = vadd.f32 %v2400_v50, %v2179_v51 }
0x1153   : > { %v2596_v53 = vpop.f32.mrf.mxu0 }
0x1154   : > { %v2183_v54 = vmax.f32 %v2180_v52, 0.0 }
0x1156   : > { %2606 = vmatmul.mubr.msk.f32.vlgmr.msra.gmra.mxu1 %vm142_vm0, %v2183_v54 }
0x1216   : > { %v2258_v55 = vpop.f32.mrf.mxu1 }
0x1217   : > { %v2259_v56 = vadd.f32 %v2402_v7, %v2258_v55 }
0x1218   : > { %v2607_v57 = vpop.f32.mrf.mxu1 }
0x1219   : > { %v2262_v58 = vadd.f32 %v2259_v56, %v2071_v27 }
0x121b   : > { %2263 = vst.msk [vmem:[%s134_s17] sm:$0xff] %vm142_vm0, %v2262_v58 }
0x121c   : > { %2682 = shalt.err (!%p2679_p3)
}
0x121d   : > { %s2683_s29 = scalar_lea.hbm %s2276_s24, 128  ;;  %s2687_s4 = scalar_lea.hbm %s3128_s2, 256 }
0x121e   : > { %p2684_p4 = scmp.ne.s32.totalorder %s2276_s24, %s2683_s29  ;;  %p2688_p9 = scmp.lt.s32.totalorder %s2276_s24, %s3128_s2 }
0x121f   : > { %p2689_p10 = scmp.lt.s32.totalorder %s2687_s4, %s2683_s29 }
0x1220   : > { %p2685_p7 = pnand %p2684_p4, %p2787_p5 }
0x1221   : > { %p2690_p11 = por %p2689_p10, %p2688_p9 }
0x1222   : > { %p2686_p8 = pneg %p2685_p7 }
0x1224   : > { %p2691_p12 = pnand %p2690_p11, %p2686_p8 }
0x1226   : > { %2694 = shalt.err (!%p2691_p12)
}
0x1227   : > { %2608 = dma.vmem_to_hbm [thread:$0]  (%p2787_p5), %s2279_s21, 128, %s2276_s24, %s2265_s25  }
0x1228 PF: > { %p2614_p13 = scmp.ge.s32.totalorder %s2729_s12, 2  ;;  %s2290_s7 = sand.u32 1, %s2717_s9  }
0x1229   : > { %s2291_s8 = scalar_lea.sflag [#allocation3], %s2290_s7 }
0x122a   : > { %p2611_p0 = pnand %p2614_p13, %p2791_p6 }
0x122c   : > { %p2612_p1 = pneg %p2611_p0 }
0x122e   : > { %2712 = dma.done.wait (%p2612_p1), %s2291_s8, 128  }
0x122f   : > { %2714 = vsyncadd (%p2612_p1), %s2291_s8, 4294967168  ;;  %p12_p2 = scmp.ge.s32.totalorder %s2774_s15, 4   ;;  %s3131_s9 = smov %s2721_s10 }
0x1230   : > { %s3132_s10 = smov %s2725_s11  ;;  %s3133_s11 = smov %s2785_s18 }
0x1231   : > { %s3134_s12 = smov %s2774_s15  ;;  %14 = sbr.rel (!%p12_p2) target bundleno = 3 (0x3), region = 63 }
0x1236   :  { %2296 = vsyncpa [#allocation3], 1 }
0x1237   :  { %2298 = vsyncpa [#allocation3 + $0x1], 1 }

</bundles_post_ra>
